<compile_context>
chip_gen: v7x
topology: tpu7x:2x2x1
jax: 0.10.0
libtpu: 0.0.40
codegen_flags: <defaults>
</compile_context>

<pallas_src>
import functools

import jax
import jax.numpy as jnp
from jax import lax
from jax.experimental import pallas as pl
from jax.experimental.pallas import tpu as pltpu

NOISE_DIM = 64
LATENT_DIM = 64
H1 = 128
H2 = 256

SUB_M = 256  # rows per in-kernel sub-tile (bounds h1/h2 live ranges)


def _round_up(x, m):
    return ((x + m - 1) // m) * m


def _cdiv(a, b):
    return -(-a // b)


def _tensorcores_per_chip():
    """v7x has 2 TensorCores per chip; v5e/v6e have 1."""
    try:
        kind = jax.devices()[0].device_kind.lower()
    except Exception:
        return 1
    return 2 if "v7" in kind else 1


_N_TC = _tensorcores_per_chip()


def _generator_kernel(sub_m, z_ref, w1_ref, b1_ref, w2_ref, b2_ref, w3_ref, b3_ref,
                      out_ref):
    bm = out_ref.shape[0]

    # Weights arrive pre-cast to bf16 (no per-grid-step cast); biases stay f32.
    w1 = w1_ref[...]
    w2 = w2_ref[...]
    w3 = w3_ref[...]
    b1 = b1_ref[...]
    b2 = b2_ref[...]
    b3 = b3_ref[...]

    def mlp_rows(row_start, rows):
        z = z_ref[pl.ds(row_start, rows), :].astype(jnp.bfloat16)
        h1 = jnp.dot(z, w1, preferred_element_type=jnp.float32)
        h1 = jnp.maximum(h1 + b1, 0.0).astype(jnp.bfloat16)
        h2 = jnp.dot(h1, w2, preferred_element_type=jnp.float32)
        h2 = jnp.maximum(h2 + b2, 0.0).astype(jnp.bfloat16)
        y = jnp.dot(h2, w3, preferred_element_type=jnp.float32) + b3
        out_ref[pl.ds(row_start, rows), :] = y.astype(out_ref.dtype)

    n_full = bm // sub_m
    if n_full > 0:
        def body(i, carry):
            r = pl.multiple_of(i * sub_m, sub_m)
            mlp_rows(r, sub_m)
            return carry
        lax.fori_loop(0, n_full, body, 0, unroll=True)

    rem = bm - n_full * sub_m
    if rem > 0:                       # static tail chunk (multiple of 8 rows)
        mlp_rows(n_full * sub_m, rem)


def _choose_tiles(B, tile_m, n_cores):
    """Pick (tm, grid_m, padded_B). tm is a multiple of 8.

    Single grid step whenever the whole (row-padded) batch fits the tile,
    except on multi-TensorCore chips (v7x) where the grid length is made a
    multiple of the TC count so the parallel batch axis load-balances.
    """
    Bp8 = _round_up(B, 8)
    tm = min(max(8, _round_up(tile_m, 8)), Bp8)
    if n_cores > 1 and Bp8 >= 8 * n_cores:
        grid_m = _round_up(max(n_cores, _cdiv(Bp8, tm)), n_cores)
        tm = max(8, _round_up(_cdiv(Bp8, grid_m), 8))
    grid_m = _cdiv(Bp8, tm)
    Bp = grid_m * tm
    return tm, grid_m, Bp


def prepare_generator_params(params):
    """Cast weights to bf16 once (MXU-native rate); biases stay f32."""
    return {
        "w1": params["w1"].astype(jnp.bfloat16),
        "b1": params["b1"].astype(jnp.float32),
        "w2": params["w2"].astype(jnp.bfloat16),
        "b2": params["b2"].astype(jnp.float32),
        "w3": params["w3"].astype(jnp.bfloat16),
        "b3": params["b3"].astype(jnp.float32),
    }


@functools.partial(jax.jit, static_argnames=("tile_m",))
def generator_forward(z, params, tile_m=1024):
    """Runs the fused 3-layer MLP as a single Pallas kernel.

    z:       [B, NOISE_DIM] float32
    params:  dict of w1/b1/w2/b2/w3/b3 (weights [in, out] -- bf16 or f32,
             biases [1, out] f32)
    returns: [B, LATENT_DIM] float32
    """
    B, nd = z.shape
    assert nd == NOISE_DIM

    tm, grid_m, Bp = _choose_tiles(B, tile_m, _N_TC)

    # Row-pad only when needed; NO lane padding (z stays 64 cols, out stays 64 cols).
    z_p = z if Bp == B else jnp.pad(z, ((0, Bp - B), (0, 0)))

    # No-op converts if params were already prepared with prepare_generator_params.
    w1 = params["w1"].astype(jnp.bfloat16)
    w2 = params["w2"].astype(jnp.bfloat16)
    w3 = params["w3"].astype(jnp.bfloat16)
    b1 = params["b1"].astype(jnp.float32)
    b2 = params["b2"].astype(jnp.float32)
    b3 = params["b3"].astype(jnp.float32)

    flops = 2 * Bp * (NOISE_DIM * H1 + H1 * H2 + H2 * LATENT_DIM)
    weight_bytes = 2 * (NOISE_DIM * H1 + H1 * H2 + H2 * LATENT_DIM)     # bf16
    bias_bytes = 4 * (H1 + H2 + LATENT_DIM)                             # f32
    bytes_accessed = 4 * Bp * (NOISE_DIM + LATENT_DIM) + weight_bytes + bias_bytes

    out = pl.pallas_call(
        functools.partial(_generator_kernel, SUB_M),
        out_shape=jax.ShapeDtypeStruct((Bp, LATENT_DIM), jnp.float32),
        grid_spec=pltpu.PrefetchScalarGridSpec(
            num_scalar_prefetch=0,
            grid=(grid_m,),
            in_specs=[
                pl.BlockSpec((tm, NOISE_DIM), lambda i: (i, 0)),   # z tile (native 64 cols)
                pl.BlockSpec((NOISE_DIM, H1), lambda i: (0, 0)),   # w1 (resident, bf16)
                pl.BlockSpec((1, H1), lambda i: (0, 0)),           # b1 (f32)
                pl.BlockSpec((H1, H2), lambda i: (0, 0)),          # w2
                pl.BlockSpec((1, H2), lambda i: (0, 0)),           # b2
                pl.BlockSpec((H2, LATENT_DIM), lambda i: (0, 0)),  # w3 (native 64 cols)
                pl.BlockSpec((1, LATENT_DIM), lambda i: (0, 0)),   # b3
            ],
            out_specs=pl.BlockSpec((tm, LATENT_DIM), lambda i: (i, 0)),
        ),
        compiler_params=pltpu.CompilerParams(
            dimension_semantics=("parallel",),
        ),
        cost_estimate=pl.CostEstimate(
            flops=flops, transcendentals=0, bytes_accessed=bytes_accessed),
    )(z_p, w1, b1, w2, b2, w3, b3)

    # Only a row slice remains (drops junk rows produced from zero-padded z).
    return out if Bp == B else out[:B]


def init_generator_params(key, noise_dim=NOISE_DIM, latent_dim=LATENT_DIM):
    """Deterministic init mimicking nn.Linear default (U[-1/sqrt(fan_in), 1/sqrt(fan_in)])."""
    ks = jax.random.split(key, 6)

    def lin(kw, kb, fan_in, fan_out):
        bound = 1.0 / jnp.sqrt(fan_in)
        w = jax.random.uniform(kw, (fan_in, fan_out), jnp.float32, -bound, bound)
        b = jax.random.uniform(kb, (1, fan_out), jnp.float32, -bound, bound)
        return w, b

    w1, b1 = lin(ks[0], ks[1], noise_dim, H1)
    w2, b2 = lin(ks[2], ks[3], H1, H2)
    w3, b3 = lin(ks[4], ks[5], H2, latent_dim)
    return {"w1": w1, "b1": b1, "w2": w2, "b2": b2, "w3": w3, "b3": b3}


def generator_reference(z, params):
    """Pure-JAX f32 reference for correctness checking."""
    h1 = jnp.maximum(z @ params["w1"] + params["b1"], 0.0)
    h2 = jnp.maximum(h1 @ params["w2"] + params["b2"], 0.0)
    return h2 @ params["w3"] + params["b3"]


if __name__ == "__main__":
    key = jax.random.PRNGKey(0)
    k_param, k_z = jax.random.split(key)

    params_f32 = init_generator_params(k_param)
    params = prepare_generator_params(params_f32)   # cast weights to bf16 once

    batch = 100  # num_new_samples in the reference script
    z = jax.random.normal(k_z, (batch, NOISE_DIM), dtype=jnp.float32)

    out = jax.block_until_ready(generator_forward(z, params))

    ref = generator_reference(z, params_f32)
    assert out.shape == (batch, LATENT_DIM), out.shape
    # bf16 matmuls with f32 accumulation -> slightly looser tolerance vs f32 reference.
    assert jnp.allclose(out, ref, atol=5e-2, rtol=5e-2), "mismatch vs reference"

    print("KERNEL_OK")
</pallas_src>

<mosaic_0001>
module attributes {stable_mosaic.version = 11 : i64} {
  func.func @_generator_kernel(%arg0: i32, %arg1: memref<104x64xf32, #tpu.memory_space<vmem>>, %arg2: memref<64x128xbf16, #tpu.memory_space<vmem>>, %arg3: memref<1x128xf32, #tpu.memory_space<vmem>>, %arg4: memref<128x256xbf16, #tpu.memory_space<vmem>>, %arg5: memref<1x256xf32, #tpu.memory_space<vmem>>, %arg6: memref<256x64xbf16, #tpu.memory_space<vmem>>, %arg7: memref<1x64xf32, #tpu.memory_space<vmem>>, %arg8: memref<104x64xf32, #tpu.memory_space<vmem>>) attributes {dimension_semantics = [#tpu.dimension_semantics<parallel>], iteration_bounds = array<i64: 1>, scalar_prefetch = 0 : i64, scratch_operands = 0 : i64, tpu.core_type = #tpu.core_type<tc>, window_params = [{transform_indices = @transform_0, window_bounds = array<i64: 104, 64>}, {pipeline_mode = #tpu.pipeline_mode<synchronous>, transform_indices = @transform_1, window_bounds = array<i64: 64, 128>}, {pipeline_mode = #tpu.pipeline_mode<synchronous>, transform_indices = @transform_2, window_bounds = array<i64: 1, 128>}, {pipeline_mode = #tpu.pipeline_mode<synchronous>, transform_indices = @transform_3, window_bounds = array<i64: 128, 256>}, {pipeline_mode = #tpu.pipeline_mode<synchronous>, transform_indices = @transform_4, window_bounds = array<i64: 1, 256>}, {pipeline_mode = #tpu.pipeline_mode<synchronous>, transform_indices = @transform_5, window_bounds = array<i64: 256, 64>}, {pipeline_mode = #tpu.pipeline_mode<synchronous>, transform_indices = @transform_6, window_bounds = array<i64: 1, 64>}, {transform_indices = @transform_7, window_bounds = array<i64: 104, 64>}]} {
    %c0 = arith.constant 0 : index
    %c0_0 = arith.constant 0 : index
    %0 = vector.load %arg2[%c0, %c0_0] : memref<64x128xbf16, #tpu.memory_space<vmem>>, vector<64x128xbf16>
    %c0_1 = arith.constant 0 : index
    %c0_2 = arith.constant 0 : index
    %1 = vector.load %arg4[%c0_1, %c0_2] : memref<128x256xbf16, #tpu.memory_space<vmem>>, vector<128x256xbf16>
    %c0_3 = arith.constant 0 : index
    %c0_4 = arith.constant 0 : index
    %2 = vector.load %arg6[%c0_3, %c0_4] : memref<256x64xbf16, #tpu.memory_space<vmem>>, vector<256x64xbf16>
    %c0_5 = arith.constant 0 : index
    %c0_6 = arith.constant 0 : index
    %3 = vector.load %arg3[%c0_5, %c0_6] : memref<1x128xf32, #tpu.memory_space<vmem>>, vector<1x128xf32>
    %c0_7 = arith.constant 0 : index
    %c0_8 = arith.constant 0 : index
    %4 = vector.load %arg5[%c0_7, %c0_8] : memref<1x256xf32, #tpu.memory_space<vmem>>, vector<1x256xf32>
    %c0_9 = arith.constant 0 : index
    %c0_10 = arith.constant 0 : index
    %5 = vector.load %arg7[%c0_9, %c0_10] : memref<1x64xf32, #tpu.memory_space<vmem>>, vector<1x64xf32>
    %c0_11 = arith.constant 0 : index
    %c0_12 = arith.constant 0 : index
    %6 = vector.load %arg1[%c0_11, %c0_12] : memref<104x64xf32, #tpu.memory_space<vmem>>, vector<104x64xf32>
    %7 = arith.truncf %6 : vector<104x64xf32> to vector<104x64xbf16>
    %cst = arith.constant dense<0.000000e+00> : vector<104x128xf32>
    %8 = tpu.matmul %7, %0, %cst {dimension_numbers = #tpu.dot_dimension_numbers<[1], [0], [0], [1], [0, 0, 1, 1], [], []>} : vector<104x64xbf16>, vector<64x128xbf16>, vector<104x128xf32> -> vector<104x128xf32>
    %9 = vector.broadcast %3 : vector<1x128xf32> to vector<104x128xf32>
    %10 = arith.addf %8, %9 : vector<104x128xf32>
    %cst_13 = arith.constant 0.000000e+00 : f32
    %11 = vector.broadcast %cst_13 : f32 to vector<104x128xf32>
    %12 = arith.maximumf %10, %11 : vector<104x128xf32>
    %13 = arith.truncf %12 : vector<104x128xf32> to vector<104x128xbf16>
    %cst_14 = arith.constant dense<0.000000e+00> : vector<104x256xf32>
    %14 = tpu.matmul %13, %1, %cst_14 {dimension_numbers = #tpu.dot_dimension_numbers<[1], [0], [0], [1], [0, 0, 1, 1], [], []>} : vector<104x128xbf16>, vector<128x256xbf16>, vector<104x256xf32> -> vector<104x256xf32>
    %15 = vector.broadcast %4 : vector<1x256xf32> to vector<104x256xf32>
    %16 = arith.addf %14, %15 : vector<104x256xf32>
    %cst_15 = arith.constant 0.000000e+00 : f32
    %17 = vector.broadcast %cst_15 : f32 to vector<104x256xf32>
    %18 = arith.maximumf %16, %17 : vector<104x256xf32>
    %19 = arith.truncf %18 : vector<104x256xf32> to vector<104x256xbf16>
    %cst_16 = arith.constant dense<0.000000e+00> : vector<104x64xf32>
    %20 = tpu.matmul %19, %2, %cst_16 {dimension_numbers = #tpu.dot_dimension_numbers<[1], [0], [0], [1], [0, 0, 1, 1], [], []>} : vector<104x256xbf16>, vector<256x64xbf16>, vector<104x64xf32> -> vector<104x64xf32>
    %21 = vector.broadcast %5 : vector<1x64xf32> to vector<104x64xf32>
    %22 = arith.addf %20, %21 : vector<104x64xf32>
    %c0_17 = arith.constant 0 : index
    %c0_18 = arith.constant 0 : index
    %23 = vector.load %arg8[%c0_17, %c0_18] : memref<104x64xf32, #tpu.memory_space<vmem>>, vector<104x64xf32>
    tpu.vector_store %arg8[%c0_17, %c0_18], %22 {strides = array<i32>} : memref<104x64xf32, #tpu.memory_space<vmem>>, vector<104x64xf32>,
    return
  }
  func.func @transform_0(%arg0: i32) -> (i32, i32) {
    %c0_i32 = arith.constant 0 : i32
    %c0_i32_0 = arith.constant 0 : i32
    return %arg0, %c0_i32 : i32, i32
  }
  func.func @transform_1(%arg0: i32) -> (i32, i32) {
    %c0_i32 = arith.constant 0 : i32
    %c0_i32_0 = arith.constant 0 : i32
    %c0_i32_1 = arith.constant 0 : i32
    return %c0_i32, %c0_i32_0 : i32, i32
  }
  func.func @transform_2(%arg0: i32) -> (i32, i32) {
    %c0_i32 = arith.constant 0 : i32
    %c0_i32_0 = arith.constant 0 : i32
    %c0_i32_1 = arith.constant 0 : i32
    return %c0_i32, %c0_i32_0 : i32, i32
  }
  func.func @transform_3(%arg0: i32) -> (i32, i32) {
    %c0_i32 = arith.constant 0 : i32
    %c0_i32_0 = arith.constant 0 : i32
    %c0_i32_1 = arith.constant 0 : i32
    return %c0_i32, %c0_i32_0 : i32, i32
  }
  func.func @transform_4(%arg0: i32) -> (i32, i32) {
    %c0_i32 = arith.constant 0 : i32
    %c0_i32_0 = arith.constant 0 : i32
    %c0_i32_1 = arith.constant 0 : i32
    return %c0_i32, %c0_i32_0 : i32, i32
  }
  func.func @transform_5(%arg0: i32) -> (i32, i32) {
    %c0_i32 = arith.constant 0 : i32
    %c0_i32_0 = arith.constant 0 : i32
    %c0_i32_1 = arith.constant 0 : i32
    return %c0_i32, %c0_i32_0 : i32, i32
  }
  func.func @transform_6(%arg0: i32) -> (i32, i32) {
    %c0_i32 = arith.constant 0 : i32
    %c0_i32_0 = arith.constant 0 : i32
    %c0_i32_1 = arith.constant 0 : i32
    return %c0_i32, %c0_i32_0 : i32, i32
  }
  func.func @transform_7(%arg0: i32) -> (i32, i32) {
    %c0_i32 = arith.constant 0 : i32
    %c0_i32_0 = arith.constant 0 : i32
    return %arg0, %c0_i32 : i32, i32
  }
}

</mosaic_0001>

<bundles_post_ra>
// kernel: generator_forward.1
= control target key start
LH: loop header
LB: loop body
LE: loop exit
PB: predicated region body
PF: predicated region fallthrough
CT: control target
= control target key end

     0   :  { %v910_v0 = vmov 0.0   ;;  %vm911_vm0 = vmmov 0   ;;  %vm136_vm1 = vcmask 523264   ;;  %v912_v41 = vmov 0   ;;  %s1257_s1 = inlined_call_operand.vmem [shape: bf16[64,128], index: 1, kind: input, shape index: {}]   ;;  %s1258_s0 = inlined_call_operand.vmem [shape: f32[104,64], index: 0, kind: input, shape index: {}]   ;;  %s1259_s3 = inlined_call_operand.vmem [shape: bf16[128,256], index: 3, kind: input, shape index: {}]   ;;  %s1260_s5 = inlined_call_operand.vmem [shape: bf16[256,64], index: 5, kind: input, shape index: {}]   ;;  %s1261_s2 = inlined_call_operand.vmem [shape: f32[1,128], index: 2, kind: input, shape index: {}]   ;;  %s1262_s4 = inlined_call_operand.vmem [shape: f32[1,256], index: 4, kind: input, shape index: {}]   ;;  %s1263_s6 = inlined_call_operand.vmem [shape: f32[1,64], index: 6, kind: input, shape index: {}]   ;;  %s1264_s7 = inlined_call_operand.vmem [shape: f32[104,64], index: 7, kind: output, shape index: {}]  }
   0x1   :  { %819 = vmatprep.subr.bf16.mxu0 %v910_v0  ;;  %v866_v1 = vld [vmem:[%s1257_s1] sm:$0xff]   ;;  %827 = vmatprep.mubr.msk.bf16.mxu0 %vm911_vm0, %v910_v0  ;;  %v867_v2 = vld [vmem:[%s1257_s1 + $0x8] sm:$0xff]   ;;  %v868_v3 = vld [vmem:[%s1257_s1 + $0x10] sm:$0xff]  }
   0x2   :  { %855 = vmatprep.subr.bf16.mxu1 %v910_v0  ;;  %843 = vmatprep.mubr.msk.bf16.mxu1 %vm911_vm0, %v910_v0  ;;  %v869_v4 = vld [vmem:[%s1257_s1 + $0x18] sm:$0xff]   ;;  %v86_v5 = vld [vmem:[%s1258_s0] sm:$0xff]  ;;  %v87_v6 = vld [vmem:[%s1258_s0 + $0x8] sm:$0xff] }
   0x3   :  { %820 = vmatpush3.bf16.msra.mxu0 %v866_v1  ;;  %859 = vmatpush3.bf16.msra.mxu1 %v866_v1  ;;  %v94_v7 = vld [vmem:[%s1258_s0 + $0x40] sm:$0xff]  ;;  %v95_v8 = vld [vmem:[%s1258_s0 + $0x48] sm:$0xff]  ;;  %v99_v10 = vpack.c.bf16 %v87_v6, %v86_v5  ;;  %v88_v13 = vld [vmem:[%s1258_s0 + $0x10] sm:$0xff] }
   0x4   :  { %821 = vmatprep.subr.bf16.mxu0 %v910_v0  ;;  %856 = vmatprep.subr.bf16.mxu1 %v910_v0  ;;  %v872_v9 = vld [vmem:[%s1259_s3 + $0x4] ss:$8 sps:$4 sm:$0xff]   ;;  %v103_v11 = vpack.c.bf16 %v95_v8, %v94_v7  ;;  %v870_v12 = vld [vmem:[%s1259_s3] ss:$8 sps:$4 sm:$0xff]   ;;  %v875_v14 = vld [vmem:[%s1259_s3 + $0x14] ss:$8 sps:$4 sm:$0xff]  }
   0x5   :  { %v89_v15 = vld [vmem:[%s1258_s0 + $0x18] sm:$0xff]  ;;  %v96_v16 = vld [vmem:[%s1258_s0 + $0x50] sm:$0xff]  ;;  %v878_v19 = vld [vmem:[%s1259_s3 + $0x24] ss:$8 sps:$4 sm:$0xff]  }
   0x6   :  { %v97_v17 = vld [vmem:[%s1258_s0 + $0x58] sm:$0xff]  ;;  %v100_v20 = vpack.c.bf16 %v89_v15, %v88_v13  ;;  %v876_v22 = vld [vmem:[%s1259_s3 + $0x20] ss:$8 sps:$4 sm:$0xff]   ;;  %v884_v28 = vld [vmem:[%s1259_s3 + $0x44] ss:$8 sps:$4 sm:$0xff]  }
   0x7   :  { %822 = vmatpush3.bf16.msra.mxu0 %v867_v2  ;;  %860 = vmatpush3.bf16.msra.mxu1 %v867_v2  ;;  %v873_v18 = vld [vmem:[%s1259_s3 + $0x10] ss:$8 sps:$4 sm:$0xff]   ;;  %v104_v21 = vpack.c.bf16 %v97_v17, %v96_v16  ;;  %v881_v23 = vld [vmem:[%s1259_s3 + $0x34] ss:$8 sps:$4 sm:$0xff]   ;;  %v90_v24 = vld [vmem:[%s1258_s0 + $0x20] sm:$0xff] }
   0x8   :  { %823 = vmatprep.subr.bf16.mxu0 %v910_v0  ;;  %857 = vmatprep.subr.bf16.mxu1 %v910_v0  ;;  %v91_v25 = vld [vmem:[%s1258_s0 + $0x28] sm:$0xff]  ;;  %v98_v26 = vld [vmem:[%s1258_s0 + $0x60] sm:$0xff]  ;;  %v879_v27 = vld [vmem:[%s1259_s3 + $0x30] ss:$8 sps:$4 sm:$0xff]  }
   0x9   :  { %v101_v29 = vpack.c.bf16 %v91_v25, %v90_v24  ;;  %v105_v30 = vpack.c.bf16 %v98_v26, %v98_v26  ;;  %v882_v31 = vld [vmem:[%s1259_s3 + $0x40] ss:$8 sps:$4 sm:$0xff]   ;;  %v887_v32 = vld [vmem:[%s1259_s3 + $0x54] ss:$8 sps:$4 sm:$0xff]   ;;  %v885_v35 = vld [vmem:[%s1259_s3 + $0x50] ss:$8 sps:$4 sm:$0xff]  }
   0xa   :  { %v92_v33 = vld [vmem:[%s1258_s0 + $0x30] sm:$0xff]  ;;  %v93_v34 = vld [vmem:[%s1258_s0 + $0x38] sm:$0xff]  ;;  %v890_v37 = vld [vmem:[%s1259_s3 + $0x64] ss:$8 sps:$4 sm:$0xff]  }
   0xb   :  { %824 = vmatpush3.bf16.msra.mxu0 %v868_v3  ;;  %861 = vmatpush3.bf16.msra.mxu1 %v868_v3  ;;  %v102_v36 = vpack.c.bf16 %v93_v34, %v92_v33  ;;  %v888_v38 = vld [vmem:[%s1259_s3 + $0x60] ss:$8 sps:$4 sm:$0xff]   ;;  %v893_v39 = vld [vmem:[%s1259_s3 + $0x74] ss:$8 sps:$4 sm:$0xff]   ;;  %v891_v40 = vld [vmem:[%s1259_s3 + $0x70] ss:$8 sps:$4 sm:$0xff]  }
   0xc   :  { %825 = vmatprep.subr.bf16.mxu0 %v910_v0  ;;  %858 = vmatprep.subr.bf16.mxu1 %v910_v0  ;;  %v894_v42 = vld [vmem:[%s1260_s5 + $0x40] sm:$0xff]   ;;  %v896_v44 = vld [vmem:[%s1260_s5 + $0x48] sm:$0xff]   ;;  %v898_v46 = vld [vmem:[%s1260_s5 + $0x50] sm:$0xff]  }
   0xd   :  { %v895_v43 = vld [vmem:[%s1260_s5] sm:$0xff]   ;;  %v897_v45 = vld [vmem:[%s1260_s5 + $0x8] sm:$0xff]   ;;  %v899_v47 = vld [vmem:[%s1260_s5 + $0x10] sm:$0xff]  }
   0xe   :  { %v900_v48 = vld [vmem:[%s1260_s5 + $0x58] sm:$0xff]   ;;  %v902_v50 = vld [vmem:[%s1260_s5 + $0x60] sm:$0xff]   ;;  %v904_v52 = vld [vmem:[%s1260_s5 + $0x68] sm:$0xff]  }
   0xf   :  { %826 = vmatpush3.bf16.msra.mxu0 %v869_v4  ;;  %862 = vmatpush3.bf16.msra.mxu1 %v869_v4  ;;  %v901_v49 = vld [vmem:[%s1260_s5 + $0x18] sm:$0xff]   ;;  %v903_v51 = vld [vmem:[%s1260_s5 + $0x20] sm:$0xff]   ;;  %v905_v53 = vld [vmem:[%s1260_s5 + $0x28] sm:$0xff]  }
  0x10   :  { %357 = vmatprep.subr.bf16.mxu1 %v872_v9  ;;  %761 = vmatprep.subr.bf16.mxu0 %v894_v42  ;;  %v1121_v54 = vld [vmem:[%s1261_s2] ss:$0 sm:$0xff] }
  0x12   :  { %828 = vmatmul.mubr.msk.bf16.vlgmr.msra.gmra.mrb[0].mxu0 %vm136_vm1, %v99_v10  ;;  %844 = vmatmul.mubr.msk.bf16.vlgmr.msra.gmra.mrb[0].mxu1 %vm136_vm1, %v103_v11 }
  0x13   :  { %831 = vmatprep.mubr.msk.bf16.mxu0 %vm911_vm0, %v910_v0  ;;  %847 = vmatprep.mubr.msk.bf16.mxu1 %vm911_vm0, %v910_v0 }
  0x14   :  { %358 = vmatpush1.bf16.msra.mxu1 %v870_v12  ;;  %762 = vmatpush3.bf16.msra.mxu0 %v895_v43 }
  0x15   :  { %359 = vmatprep.subr.bf16.mxu1 %v875_v14  ;;  %763 = vmatprep.subr.bf16.mxu0 %v896_v44 }
  0x18   :  { %360 = vmatpush1.bf16.msra.mxu1 %v873_v18  ;;  %764 = vmatpush3.bf16.msra.mxu0 %v897_v45 }
  0x19   :  { %361 = vmatprep.subr.bf16.mxu1 %v878_v19  ;;  %765 = vmatprep.subr.bf16.mxu0 %v898_v46 }
  0x1a   :  { %832 = vmatmul.mubr.msk.bf16.gmra.mrb[4].mxu0 %vm136_vm1, %v100_v20  ;;  %848 = vmatmul.mubr.msk.bf16.gmra.mrb[4].mxu1 %vm136_vm1, %v104_v21 }
  0x1b   :  { %835 = vmatprep.mubr.msk.bf16.mxu0 %vm911_vm0, %v910_v0  ;;  %851 = vmatprep.mubr.msk.bf16.mxu1 %vm911_vm0, %v910_v0 }
  0x1c   :  { %362 = vmatpush1.bf16.msra.mxu1 %v876_v22  ;;  %766 = vmatpush3.bf16.msra.mxu0 %v899_v47 }
  0x1d   :  { %363 = vmatprep.subr.bf16.mxu1 %v881_v23  ;;  %767 = vmatprep.subr.bf16.mxu0 %v900_v48 }
  0x20   :  { %364 = vmatpush1.bf16.msra.mxu1 %v879_v27  ;;  %768 = vmatpush3.bf16.msra.mxu0 %v901_v49 }
  0x21   :  { %365 = vmatprep.subr.bf16.mxu1 %v884_v28  ;;  %769 = vmatprep.subr.bf16.mxu0 %v902_v50 }
  0x22   :  { %836 = vmatmul.mubr.msk.bf16.gmra.mrb[8].mxu0 %vm136_vm1, %v101_v29  ;;  %852 = vmatmul.mubr.msk.bf16.gmra.mrb[8].mxu1 %vm136_vm1, %v105_v30 }
  0x23   :  { %839 = vmatprep.mubr.msk.bf16.mxu0 %vm911_vm0, %v910_v0  ;;  %389 = vmatprep.mubr.bf16.mxu1 %v912_v41 }
  0x24   :  { %366 = vmatpush1.bf16.msra.mxu1 %v882_v31  ;;  %770 = vmatpush3.bf16.msra.mxu0 %v903_v51 }
  0x25   :  { %367 = vmatprep.subr.bf16.mxu1 %v887_v32  ;;  %771 = vmatprep.subr.bf16.mxu0 %v904_v52 }
  0x28   :  { %368 = vmatpush1.bf16.msra.mxu1 %v885_v35  ;;  %772 = vmatpush3.bf16.msra.mxu0 %v905_v53  ;;  %v906_v53 = vld [vmem:[%s1260_s5 + $0x70] sm:$0xff]  }
  0x29   :  { %369 = vmatprep.subr.bf16.mxu1 %v890_v37  ;;  %773 = vmatprep.subr.bf16.mxu0 %v906_v53 }
  0x2a   :  { %840 = vmatmul.mubr.msk.bf16.gmra.mrb[12].mxu0 %vm136_vm1, %v102_v36 }
  0x2c   :  { %370 = vmatpush1.bf16.msra.mxu1 %v888_v38 }
  0x2d   :  { %371 = vmatprep.subr.bf16.mxu1 %v893_v39 }
  0x30   :  { %372 = vmatpush1.bf16.msra.mxu1 %v891_v40 }
  0xe5   :  { %v192_v55 = vpop.f32.mrb[0].mxu0  ;;  %v224_v56 = vpop.f32.mrb[0].mxu1 }
  0xe6   :  { %v193_v57 = vadd.f32 %v1121_v54, %v192_v55  ;;  %v829_v58 = vpop.f32.mrb[1].mxu0  ;;  %v225_v59 = vadd.f32 %v1121_v54, %v224_v56  ;;  %v845_v60 = vpop.f32.mrb[1].mxu1  ;;  %v907_v55 = vld [vmem:[%s1260_s5 + $0x30] sm:$0xff]   ;;  %v267_v56 = vlaneseq }
  0xe7   :  { %v195_v61 = vpop.f32.mrb[2].mxu0  ;;  %v227_v62 = vpop.f32.mrb[2].mxu1  ;;  %774 = vmatpush3.bf16.msra.mxu0 %v907_v55 }
  0xe8   :  { %v196_v63 = vadd.f32 %v1121_v54, %v195_v61  ;;  %v830_v0 = vpop.f32.mrb[3].mxu0  ;;  %v254_v1 = vmax.f32 %v225_v59, 0.0  ;;  %v228_v2 = vadd.f32 %v1121_v54, %v227_v62  ;;  %v846_v3 = vpop.f32.mrb[3].mxu1  ;;  %v246_v4 = vmax.f32 %v193_v57, 0.0  ;;  %v84_v59 = vld [vmem:[%s1262_s4] sm:$0x3] }
  0xe9   :  { %v268_v57 = vshrl.u32 %v267_v56, 7 }
  0xea   :  { %v247_v5 = vmax.f32 %v196_v63, 0.0  ;;  %v255_v6 = vmax.f32 %v228_v2, 0.0 }
  0xeb   :  { %v269_v58 = vsub.s32 0, %v268_v57  ;;  %v273_v60 = vsub.s32 1, %v268_v57 }
  0xec   :  { %v259_v7 = vpack.c.bf16 %v247_v5, %v246_v4  ;;  %v263_v8 = vpack.c.bf16 %v255_v6, %v254_v1 }
  0xed   :  { %v200_v9 = vpop.f32.mrb[4].mxu0  ;;  %v232_v10 = vpop.f32.mrb[4].mxu1  ;;  %v1157_v61 = vrot.slane %v84_v59, %v269_v58  ;;  %v1159_v62 = vrot.slane %v84_v59, %v273_v60 }
  0xee   :  { %v201_v11 = vadd.f32 %v1121_v54, %v200_v9  ;;  %v833_v12 = vpop.f32.mrb[5].mxu0  ;;  %390 = vmatmul.mubr.bf16.vlgmr.msra.gmra.mrb[12].mxu1 %v259_v7  ;;  %v233_v13 = vadd.f32 %v1121_v54, %v232_v10  ;;  %v849_v14 = vpop.f32.mrb[5].mxu1 }
  0xef   :  { %v203_v15 = vpop.f32.mrb[6].mxu0  ;;  %399 = vmatprep.mubr.bf16.mxu1 %v912_v41  ;;  %v235_v16 = vpop.f32.mrb[6].mxu1 }
  0xf0   :  { %v204_v17 = vadd.f32 %v1121_v54, %v203_v15  ;;  %v834_v18 = vpop.f32.mrb[7].mxu0  ;;  %v256_v19 = vmax.f32 %v233_v13, 0.0  ;;  %v236_v20 = vadd.f32 %v1121_v54, %v235_v16  ;;  %v850_v21 = vpop.f32.mrb[7].mxu1  ;;  %v248_v22 = vmax.f32 %v201_v11, 0.0 }
  0xf2   :  { %v249_v23 = vmax.f32 %v204_v17, 0.0  ;;  %v257_v24 = vmax.f32 %v236_v20, 0.0 }
  0xf4   :  { %v260_v25 = vpack.c.bf16 %v249_v23, %v248_v22  ;;  %v264_v26 = vpack.c.bf16 %v257_v24, %v256_v19 }
  0xf5   :  { %v208_v27 = vpop.f32.mrb[8].mxu0  ;;  %v240_v28 = vpop.f32.mrb[8].mxu1 }
  0xf6   :  { %v209_v29 = vadd.f32 %v1121_v54, %v208_v27  ;;  %v837_v30 = vpop.f32.mrb[9].mxu0  ;;  %400 = vmatmul.mubr.bf16.gmra.mrb[16].mxu1 %v260_v25  ;;  %v853_v31 = vpop.f32.mrb[9].mxu1  ;;  %v241_v50 = vadd.f32 %v1121_v54, %v240_v28 }
  0xf7   :  { %v211_v32 = vpop.f32.mrb[10].mxu0  ;;  %409 = vmatprep.mubr.bf16.mxu1 %v912_v41  ;;  %v243_v33 = vpop.f32.mrb[10].mxu1 }
  0xf8   :  { %v212_v34 = vadd.f32 %v1121_v54, %v211_v32  ;;  %v838_v35 = vpop.f32.mrb[11].mxu0  ;;  %v854_v36 = vpop.f32.mrb[11].mxu1  ;;  %v250_v37 = vmax.f32 %v209_v29, 0.0  ;;  %v258_v51 = vmax.f32 %v241_v50, 0.0 }
  0xfa   :  { %v251_v38 = vmax.f32 %v212_v34, 0.0  ;;  %v265_v52 = vpack.c.bf16 %v258_v51, %v258_v51 }
  0xfc   :  { %v261_v39 = vpack.c.bf16 %v251_v38, %v250_v37 }
  0xfd   :  { %v216_v40 = vpop.f32.mrb[12].mxu0 }
  0xfe   :  { %v217_v42 = vadd.f32 %v1121_v54, %v216_v40  ;;  %v841_v43 = vpop.f32.mrb[13].mxu0  ;;  %410 = vmatmul.mubr.bf16.gmra.mrb[20].mxu1 %v261_v39 }
  0xff   :  { %v219_v44 = vpop.f32.mrb[14].mxu0  ;;  %419 = vmatprep.mubr.bf16.mxu1 %v912_v41 }
 0x100   :  { %v220_v45 = vadd.f32 %v1121_v54, %v219_v44  ;;  %v842_v46 = vpop.f32.mrb[15].mxu0  ;;  %v252_v47 = vmax.f32 %v217_v42, 0.0  ;;  %v908_v54 = vld [vmem:[%s1260_s5 + $0x78] sm:$0xff]  }
 0x101   :  { %775 = vmatprep.subr.bf16.mxu0 %v908_v54 }
 0x102   :  { %v253_v48 = vmax.f32 %v220_v45, 0.0 }
 0x104   :  { %v262_v49 = vpack.c.bf16 %v253_v48, %v252_v47 }
 0x106   :  { %420 = vmatmul.mubr.bf16.gmra.mrb[24].mxu1 %v262_v49 }
 0x107   :  { %429 = vmatprep.mubr.bf16.mxu1 %v912_v41 }
 0x10e   :  { %430 = vmatmul.mubr.bf16.gmra.mrb[28].mxu1 %v263_v8 }
 0x10f   :  { %439 = vmatprep.mubr.bf16.mxu1 %v912_v41 }
 0x116   :  { %440 = vmatmul.mubr.bf16.gmra.mrb[32].mxu1 %v264_v26 }
 0x117   :  { %449 = vmatprep.mubr.bf16.mxu1 %v912_v41  ;;  %v909_v41 = vld [vmem:[%s1260_s5 + $0x38] sm:$0xff]  }
 0x118   :  { %776 = vmatpush3.bf16.msra.mxu0 %v909_v41 }
 0x11e   :  { %450 = vmatmul.mubr.bf16.gmra.mrb[36].mxu1 %v265_v52 }
 0x1c1   :  { %v391_v63 = vpop.f32.mrb[12].mxu1 }
 0x1c2   :  { %v392_v0 = vadd.f32 %v391_v63, %v1157_v61  ;;  %v393_v1 = vpop.f32.mrb[13].mxu1 }
 0x1c3   :  { %v394_v2 = vadd.f32 %v393_v1, %v1159_v62  ;;  %v395_v3 = vpop.f32.mrb[14].mxu1 }
 0x1c4   :  { %v396_v4 = vadd.f32 %v395_v3, %v1157_v61  ;;  %v397_v5 = vpop.f32.mrb[15].mxu1  ;;  %v458_v7 = vmax.f32 %v392_v0, 0.0 }
 0x1c5   :  { %v398_v6 = vadd.f32 %v397_v5, %v1159_v62  ;;  %v459_v9 = vmax.f32 %v394_v2, 0.0 }
 0x1c6   :  { %v460_v8 = vmax.f32 %v396_v4, 0.0 }
 0x1c7   :  { %v461_v10 = vmax.f32 %v398_v6, 0.0 }
 0x1c8   :  { %v484_v11 = vpack.c.bf16 %v460_v8, %v458_v7 }
 0x1c9   :  { %v485_v12 = vpack.c.bf16 %v461_v10, %v459_v9  ;;  %v401_v13 = vpop.f32.mrb[16].mxu1 }
 0x1ca   :  { %v402_v14 = vadd.f32 %v401_v13, %v1157_v61  ;;  %v403_v15 = vpop.f32.mrb[17].mxu1 }
 0x1cb   :  { %v404_v16 = vadd.f32 %v403_v15, %v1159_v62  ;;  %v405_v17 = vpop.f32.mrb[18].mxu1  ;;  %632 = vmatprep.mubr.bf16.mxu0 %v485_v12 }
 0x1cc   :  { %v406_v18 = vadd.f32 %v405_v17, %v1157_v61  ;;  %v407_v19 = vpop.f32.mrb[19].mxu1  ;;  %633 = vmatmul.mubr.bf16.vlgmr.msra.gmra.mrb[16].mxu0 %v484_v11  ;;  %v462_v21 = vmax.f32 %v402_v14, 0.0 }
 0x1cd   :  { %v408_v20 = vadd.f32 %v407_v19, %v1159_v62  ;;  %v463_v23 = vmax.f32 %v404_v16, 0.0 }
 0x1ce   :  { %v464_v22 = vmax.f32 %v406_v18, 0.0 }
 0x1cf   :  { %v465_v24 = vmax.f32 %v408_v20, 0.0 }
 0x1d0   :  { %v486_v25 = vpack.c.bf16 %v464_v22, %v462_v21 }
 0x1d1   :  { %v487_v26 = vpack.c.bf16 %v465_v24, %v463_v23  ;;  %v411_v27 = vpop.f32.mrb[20].mxu1 }
 0x1d2   :  { %v412_v28 = vadd.f32 %v411_v27, %v1157_v61  ;;  %v413_v29 = vpop.f32.mrb[21].mxu1 }
 0x1d3   :  { %v414_v30 = vadd.f32 %v413_v29, %v1159_v62  ;;  %v415_v31 = vpop.f32.mrb[22].mxu1  ;;  %640 = vmatprep.mubr.bf16.mxu0 %v487_v26 }
 0x1d4   :  { %v416_v32 = vadd.f32 %v415_v31, %v1157_v61  ;;  %v417_v33 = vpop.f32.mrb[23].mxu1  ;;  %641 = vmatmul.mubr.bf16.gmra.mrb[20].mxu0 %v486_v25  ;;  %v466_v35 = vmax.f32 %v412_v28, 0.0 }
 0x1d5   :  { %v418_v34 = vadd.f32 %v417_v33, %v1159_v62  ;;  %v467_v37 = vmax.f32 %v414_v30, 0.0 }
 0x1d6   :  { %v468_v36 = vmax.f32 %v416_v32, 0.0  ;;  %v1190_v32 = vld [vmem:[%s1263_s6] ss:$0 sm:$0xff] }
 0x1d7   :  { %v469_v38 = vmax.f32 %v418_v34, 0.0 }
 0x1d8   :  { %v488_v39 = vpack.c.bf16 %v468_v36, %v466_v35 }
 0x1d9   :  { %v489_v40 = vpack.c.bf16 %v469_v38, %v467_v37  ;;  %v421_v42 = vpop.f32.mrb[24].mxu1 }
 0x1da   :  { %v422_v43 = vadd.f32 %v421_v42, %v1157_v61  ;;  %v423_v44 = vpop.f32.mrb[25].mxu1 }
 0x1db   :  { %v424_v45 = vadd.f32 %v423_v44, %v1159_v62  ;;  %v425_v46 = vpop.f32.mrb[26].mxu1  ;;  %648 = vmatprep.mubr.bf16.mxu0 %v489_v40 }
 0x1dc   :  { %v426_v47 = vadd.f32 %v425_v46, %v1157_v61  ;;  %v427_v48 = vpop.f32.mrb[27].mxu1  ;;  %649 = vmatmul.mubr.bf16.gmra.mrb[24].mxu0 %v488_v39  ;;  %v470_v50 = vmax.f32 %v422_v43, 0.0 }
 0x1dd   :  { %v428_v49 = vadd.f32 %v427_v48, %v1159_v62  ;;  %v471_v52 = vmax.f32 %v424_v45, 0.0 }
 0x1de   :  { %v472_v51 = vmax.f32 %v426_v47, 0.0 }
 0x1df   :  { %v473_v53 = vmax.f32 %v428_v49, 0.0 }
 0x1e0   :  { %v490_v55 = vpack.c.bf16 %v472_v51, %v470_v50 }
 0x1e1   :  { %v491_v54 = vpack.c.bf16 %v473_v53, %v471_v52  ;;  %v431_v41 = vpop.f32.mrb[28].mxu1 }
 0x1e2   :  { %v432_v56 = vadd.f32 %v431_v41, %v1157_v61  ;;  %v433_v57 = vpop.f32.mrb[29].mxu1 }
 0x1e3   :  { %v434_v58 = vadd.f32 %v433_v57, %v1159_v62  ;;  %v435_v59 = vpop.f32.mrb[30].mxu1  ;;  %656 = vmatprep.mubr.bf16.mxu0 %v491_v54 }
 0x1e4   :  { %v436_v60 = vadd.f32 %v435_v59, %v1157_v61  ;;  %v437_v63 = vpop.f32.mrb[31].mxu1  ;;  %657 = vmatmul.mubr.bf16.gmra.mrb[28].mxu0 %v490_v55  ;;  %v474_v1 = vmax.f32 %v432_v56, 0.0 }
 0x1e5   :  { %v438_v0 = vadd.f32 %v437_v63, %v1159_v62  ;;  %v475_v3 = vmax.f32 %v434_v58, 0.0 }
 0x1e6   :  { %v476_v2 = vmax.f32 %v436_v60, 0.0 }
 0x1e7   :  { %v477_v4 = vmax.f32 %v438_v0, 0.0 }
 0x1e8   :  { %v492_v5 = vpack.c.bf16 %v476_v2, %v474_v1 }
 0x1e9   :  { %v493_v6 = vpack.c.bf16 %v477_v4, %v475_v3  ;;  %v441_v7 = vpop.f32.mrb[32].mxu1 }
 0x1ea   :  { %v442_v8 = vadd.f32 %v441_v7, %v1157_v61  ;;  %v443_v9 = vpop.f32.mrb[33].mxu1 }
 0x1eb   :  { %v444_v10 = vadd.f32 %v443_v9, %v1159_v62  ;;  %v445_v11 = vpop.f32.mrb[34].mxu1  ;;  %664 = vmatprep.mubr.bf16.mxu0 %v493_v6 }
 0x1ec   :  { %v446_v12 = vadd.f32 %v445_v11, %v1157_v61  ;;  %v447_v13 = vpop.f32.mrb[35].mxu1  ;;  %665 = vmatmul.mubr.bf16.gmra.mrb[32].mxu0 %v492_v5  ;;  %v478_v15 = vmax.f32 %v442_v8, 0.0 }
 0x1ed   :  { %v448_v14 = vadd.f32 %v447_v13, %v1159_v62  ;;  %v479_v17 = vmax.f32 %v444_v10, 0.0 }
 0x1ee   :  { %v480_v16 = vmax.f32 %v446_v12, 0.0 }
 0x1ef   :  { %v481_v18 = vmax.f32 %v448_v14, 0.0 }
 0x1f0   :  { %v494_v19 = vpack.c.bf16 %v480_v16, %v478_v15 }
 0x1f1   :  { %v495_v20 = vpack.c.bf16 %v481_v18, %v479_v17  ;;  %v451_v21 = vpop.f32.mrb[36].mxu1 }
 0x1f2   :  { %v452_v22 = vadd.f32 %v451_v21, %v1157_v61  ;;  %v453_v23 = vpop.f32.mrb[37].mxu1 }
 0x1f3   :  { %v454_v24 = vadd.f32 %v453_v23, %v1159_v62  ;;  %v455_v25 = vpop.f32.mrb[38].mxu1  ;;  %672 = vmatprep.mubr.bf16.mxu0 %v495_v20 }
 0x1f4   :  { %v456_v26 = vpop.f32.mrb[39].mxu1  ;;  %673 = vmatmul.mubr.bf16.gmra.mrb[36].mxu0 %v494_v19  ;;  %v482_v28 = vmax.f32 %v452_v22, 0.0 }
 0x1f5   :  { %v483_v27 = vmax.f32 %v454_v24, 0.0 }
 0x1f6   :  { %v496_v30 = vpack.c.bf16 %v482_v28, %v482_v28 }
 0x1f7   :  { %v497_v29 = vpack.c.bf16 %v483_v27, %v483_v27 }
 0x1f9   :  { %680 = vmatprep.mubr.bf16.mxu0 %v497_v29 }
 0x1fc   :  { %681 = vmatmul.mubr.bf16.gmra.mrb[40].mxu0 %v496_v30 }
 0x29f   :  { %v777_v31 = vpop.f32.mrb[16].mxu0 }
 0x2a0   :  { %v778_v61 = vpop.f32.mrb[17].mxu0 }
 0x2a1   :  { %v779_v33 = vadd.f32 %v778_v61, %v777_v31  ;;  %v780_v34 = vpop.f32.mrb[18].mxu0 }
 0x2a2   :  { %v781_v62 = vpop.f32.mrb[19].mxu0 }
 0x2a3   :  { %v635_v35 = vadd.f32 %v779_v33, %v1190_v32  ;;  %v782_v36 = vadd.f32 %v781_v62, %v780_v34 }
 0x2a5   :  { %688 = vst.msk [vmem:[%s1264_s7] sm:$0xff] %vm136_vm1, %v635_v35  ;;  %v638_v37 = vadd.f32 %v782_v36, %v1190_v32 }
 0x2a7   :  { %689 = vst.msk [vmem:[%s1264_s7 + $0x8] sm:$0xff] %vm136_vm1, %v638_v37  ;;  %v783_v38 = vpop.f32.mrb[20].mxu0 }
 0x2a8   :  { %v784_v39 = vpop.f32.mrb[21].mxu0 }
 0x2a9   :  { %v785_v40 = vadd.f32 %v784_v39, %v783_v38  ;;  %v786_v42 = vpop.f32.mrb[22].mxu0 }
 0x2aa   :  { %v787_v43 = vpop.f32.mrb[23].mxu0 }
 0x2ab   :  { %v643_v44 = vadd.f32 %v785_v40, %v1190_v32  ;;  %v788_v45 = vadd.f32 %v787_v43, %v786_v42 }
 0x2ad   :  { %690 = vst.msk [vmem:[%s1264_s7 + $0x10] sm:$0xff] %vm136_vm1, %v643_v44  ;;  %v646_v46 = vadd.f32 %v788_v45, %v1190_v32 }
 0x2af   :  { %691 = vst.msk [vmem:[%s1264_s7 + $0x18] sm:$0xff] %vm136_vm1, %v646_v46  ;;  %v789_v47 = vpop.f32.mrb[24].mxu0 }
 0x2b0   :  { %v790_v48 = vpop.f32.mrb[25].mxu0 }
 0x2b1   :  { %v791_v49 = vadd.f32 %v790_v48, %v789_v47  ;;  %v792_v50 = vpop.f32.mrb[26].mxu0 }
 0x2b2   :  { %v793_v51 = vpop.f32.mrb[27].mxu0 }
 0x2b3   :  { %v651_v52 = vadd.f32 %v791_v49, %v1190_v32  ;;  %v794_v53 = vadd.f32 %v793_v51, %v792_v50 }
 0x2b5   :  { %692 = vst.msk [vmem:[%s1264_s7 + $0x20] sm:$0xff] %vm136_vm1, %v651_v52  ;;  %v654_v55 = vadd.f32 %v794_v53, %v1190_v32 }
 0x2b7   :  { %693 = vst.msk [vmem:[%s1264_s7 + $0x28] sm:$0xff] %vm136_vm1, %v654_v55  ;;  %v795_v54 = vpop.f32.mrb[28].mxu0 }
 0x2b8   :  { %v796_v41 = vpop.f32.mrb[29].mxu0 }
 0x2b9   :  { %v797_v56 = vadd.f32 %v796_v41, %v795_v54  ;;  %v798_v57 = vpop.f32.mrb[30].mxu0 }
 0x2ba   :  { %v799_v58 = vpop.f32.mrb[31].mxu0 }
 0x2bb   :  { %v659_v59 = vadd.f32 %v797_v56, %v1190_v32  ;;  %v800_v60 = vadd.f32 %v799_v58, %v798_v57 }
 0x2bd   :  { %694 = vst.msk [vmem:[%s1264_s7 + $0x30] sm:$0xff] %vm136_vm1, %v659_v59  ;;  %v662_v63 = vadd.f32 %v800_v60, %v1190_v32 }
 0x2bf   :  { %695 = vst.msk [vmem:[%s1264_s7 + $0x38] sm:$0xff] %vm136_vm1, %v662_v63  ;;  %v801_v0 = vpop.f32.mrb[32].mxu0 }
 0x2c0   :  { %v802_v1 = vpop.f32.mrb[33].mxu0 }
 0x2c1   :  { %v803_v2 = vadd.f32 %v802_v1, %v801_v0  ;;  %v804_v3 = vpop.f32.mrb[34].mxu0 }
 0x2c2   :  { %v805_v4 = vpop.f32.mrb[35].mxu0 }
 0x2c3   :  { %v667_v5 = vadd.f32 %v803_v2, %v1190_v32  ;;  %v806_v6 = vadd.f32 %v805_v4, %v804_v3 }
 0x2c5   :  { %696 = vst.msk [vmem:[%s1264_s7 + $0x40] sm:$0xff] %vm136_vm1, %v667_v5  ;;  %v670_v7 = vadd.f32 %v806_v6, %v1190_v32 }
 0x2c7   :  { %697 = vst.msk [vmem:[%s1264_s7 + $0x48] sm:$0xff] %vm136_vm1, %v670_v7  ;;  %v807_v8 = vpop.f32.mrb[36].mxu0 }
 0x2c8   :  { %v808_v9 = vpop.f32.mrb[37].mxu0 }
 0x2c9   :  { %v809_v10 = vadd.f32 %v808_v9, %v807_v8  ;;  %v810_v11 = vpop.f32.mrb[38].mxu0 }
 0x2ca   :  { %v811_v12 = vpop.f32.mrb[39].mxu0 }
 0x2cb   :  { %v675_v13 = vadd.f32 %v809_v10, %v1190_v32  ;;  %v812_v14 = vadd.f32 %v811_v12, %v810_v11 }
 0x2cd   :  { %698 = vst.msk [vmem:[%s1264_s7 + $0x50] sm:$0xff] %vm136_vm1, %v675_v13  ;;  %v678_v15 = vadd.f32 %v812_v14, %v1190_v32 }
 0x2cf   :  { %699 = vst.msk [vmem:[%s1264_s7 + $0x58] sm:$0xff] %vm136_vm1, %v678_v15  ;;  %v813_v16 = vpop.f32.mrb[40].mxu0 }
 0x2d0   :  { %v814_v17 = vpop.f32.mrb[41].mxu0 }
 0x2d1   :  { %v815_v18 = vadd.f32 %v814_v17, %v813_v16  ;;  %v816_v19 = vpop.f32.mrb[42].mxu0 }
 0x2d2   :  { %v817_v20 = vpop.f32.mrb[43].mxu0 }
 0x2d3   :  { %v683_v21 = vadd.f32 %v815_v18, %v1190_v32 }
 0x2d5   :  { %700 = vst.msk [vmem:[%s1264_s7 + $0x60] sm:$0xff] %vm136_vm1, %v683_v21 }

</bundles_post_ra>
